<compile_context>
chip_gen: v6e
topology: v6e:2x2x1
jax: 0.10.0
libtpu: 0.0.40
codegen_flags: <defaults>
</compile_context>

<pallas_src>
import jax
import jax.numpy as jnp
import numpy as np
from jax.experimental import pallas as pl
from jax.experimental.pallas import tpu as pltpu

EMBED_SIZE = 256      # module default embed_size
IN_FEATURES = 2048    # resnet50 fc.in_features
BN_EPS = 1e-5         # nn.BatchNorm1d default eps


def _encoder_head_kernel(x_ref, w_ref, aff_ref, o_ref):
    """Fused Linear -> ReLU -> BatchNorm1d on pooled features.

    Grid axis 0 ("parallel") walks the embedding dim in tiles of Et.
      x_ref   : (B, C)   f32   pooled trunk features (same block every step -> VMEM-resident)
      w_ref   : (C, Et)  bf16  embedding tile of the (transposed) Linear weight
      aff_ref : (8, Et)  f32   rows 0..2: [linear bias, bn gamma, bn beta], rest padding
      o_ref   : (B, Et)  f32   output tile
    """
    # Linear: bf16 MXU inputs, f32 accumulation.
    h = jnp.dot(x_ref[...].astype(jnp.bfloat16), w_ref[...],
                preferred_element_type=jnp.float32)                       # (B, Et) f32

    aff = aff_ref[...]
    h = jnp.maximum(h + aff[0:1, :], 0.0)                                 # + bias, ReLU

    # BatchNorm1d in training mode: per-feature batch statistics (biased variance).
    mu = jnp.mean(h, axis=0, keepdims=True)
    var = jnp.mean(jnp.square(h - mu), axis=0, keepdims=True)
    xhat = (h - mu) * jax.lax.rsqrt(var + BN_EPS)
    o_ref[...] = (xhat * aff[1:2, :] + aff[2:3, :]).astype(o_ref.dtype)


def _tensorcores_per_chip():
    """Best-effort generation detection: 2 TCs on v7x, 1 on v5e/v6e. Safe fallback = 1."""
    try:
        kind = jax.devices()[0].device_kind.lower()
        if "v7" in kind:
            return 2
    except Exception:
        pass
    return 1


def encoder_rasha_forward(feat_nchw, params, *, e_tile=None):
    """feat_nchw: (B, C, H, W) trunk feature map.  Returns (B, embed_size) f32."""
    w_t, affine = params                      # (C, E) bf16, (8, E) f32
    B, C, H, W = feat_nchw.shape
    Cw, E = w_t.shape
    assert Cw == C, "weight contraction dim must match channel dim"

    if e_tile is None:
        # 1-TC chips (v5e/v6e): single grid step.  v7x: 2-way E split across the TensorCores.
        e_tile = E // 2 if (_tensorcores_per_chip() == 2 and E % 2 == 0 and E // 2 >= 128) else E
    e_tile = min(e_tile, E)
    assert E % e_tile == 0, "embed dim must be divisible by the embedding tile"

    # AdaptiveAvgPool2d((1,1)) + flatten: streaming XLA reduce over the contiguous NCHW layout.
    pooled = jnp.mean(feat_nchw, axis=(2, 3))                             # (B, C) f32

    bytes_accessed = (pooled.size * 4) + (w_t.size * 2) + (affine.size * 4) + (B * E * 4)
    return pl.pallas_call(
        _encoder_head_kernel,
        out_shape=jax.ShapeDtypeStruct((B, E), jnp.float32),
        grid_spec=pltpu.PrefetchScalarGridSpec(
            num_scalar_prefetch=0,
            grid=(E // e_tile,),
            in_specs=[
                # Same block index every step -> pooled x stays VMEM-resident (no re-DMA).
                pl.BlockSpec((B, C), lambda j: (0, 0)),
                pl.BlockSpec((C, e_tile), lambda j: (0, j)),
                pl.BlockSpec((8, e_tile), lambda j: (0, j)),
            ],
            out_specs=pl.BlockSpec((B, e_tile), lambda j: (0, j)),
        ),
        compiler_params=pltpu.CompilerParams(
            dimension_semantics=("parallel",),   # v7x: half of E per TensorCore
        ),
        cost_estimate=pl.CostEstimate(
            flops=2 * B * C * E, transcendentals=0, bytes_accessed=bytes_accessed),
    )(pooled, w_t, affine)


def init_params(key, in_features=IN_FEATURES, embed_size=EMBED_SIZE):
    """Deterministic synthetic params matching nn.Linear / nn.BatchNorm1d shapes."""
    k1, k2 = jax.random.split(key)
    bound = 1.0 / np.sqrt(in_features)
    # torch nn.Linear weight layout is (E, C); store transposed (C, E) in bf16 for the MXU.
    w = jax.random.uniform(k1, (embed_size, in_features), jnp.float32, -bound, bound)
    b = jax.random.uniform(k2, (embed_size,), jnp.float32, -bound, bound)
    gamma = jnp.ones((embed_size,), jnp.float32)    # BatchNorm1d default affine init
    beta = jnp.zeros((embed_size,), jnp.float32)
    w_t = w.T.astype(jnp.bfloat16)                  # (C, E) bf16
    # Rows: [bias, gamma, beta] padded to a full 8-row sublane group (unmasked loads).
    affine = jnp.zeros((8, embed_size), jnp.float32)
    affine = affine.at[0].set(b).at[1].set(gamma).at[2].set(beta)
    return (w_t, affine)


def reference_forward(feat_nchw, params):
    """Pure-JAX reference of bn(relu(linear(avgpool(feat).flatten()))).

    Mirrors the kernel's mixed-precision policy: bf16 matmul inputs, f32 accumulation.
    """
    w_t, affine = params
    bias, gamma, beta = affine[0:1], affine[1:2], affine[2:3]
    pooled = jnp.mean(feat_nchw, axis=(2, 3))                  # AdaptiveAvgPool2d((1,1)) + view
    h = jnp.dot(pooled.astype(jnp.bfloat16), w_t,
                preferred_element_type=jnp.float32) + bias     # Linear
    h = jnp.maximum(h, 0.0)                                    # ReLU
    mu = jnp.mean(h, axis=0, keepdims=True)                    # BatchNorm1d (batch stats)
    var = jnp.mean(jnp.square(h - mu), axis=0, keepdims=True)
    return (h - mu) * jax.lax.rsqrt(var + BN_EPS) * gamma + beta


if __name__ == "__main__":
    key = jax.random.PRNGKey(0)
    kx, kp = jax.random.split(key)

    # Trunk output feature map (what resnet50 layer4 produces for 224x224 inputs).
    B, C, H, W = 2, IN_FEATURES, 7, 7
    feat = jax.random.normal(kx, (B, C, H, W), dtype=jnp.float32)
    params = init_params(kp, in_features=C, embed_size=EMBED_SIZE)

    out = jax.block_until_ready(encoder_rasha_forward(feat, params))
    ref = reference_forward(feat, params)

    assert out.shape == (B, EMBED_SIZE) and out.dtype == jnp.float32
    if not np.allclose(np.asarray(out), np.asarray(ref), atol=1e-2, rtol=1e-2):
        raise AssertionError("Pallas kernel output mismatches JAX reference")

    print("KERNEL_OK")
</pallas_src>

<mosaic_0001>
module attributes {stable_mosaic.version = 11 : i64} {
  func.func @_encoder_head_kernel(%arg0: i32, %arg1: memref<2x2048xf32, #tpu.memory_space<vmem>>, %arg2: memref<2048x256xbf16, #tpu.memory_space<vmem>>, %arg3: memref<8x256xf32, #tpu.memory_space<vmem>>, %arg4: memref<2x256xf32, #tpu.memory_space<vmem>>) attributes {dimension_semantics = [#tpu.dimension_semantics<parallel>], iteration_bounds = array<i64: 1>, scalar_prefetch = 0 : i64, scratch_operands = 0 : i64, tpu.core_type = #tpu.core_type<tc>, window_params = [{pipeline_mode = #tpu.pipeline_mode<synchronous>, transform_indices = @transform_0, window_bounds = array<i64: 2, 2048>}, {transform_indices = @transform_1, window_bounds = array<i64: 2048, 256>}, {transform_indices = @transform_2, window_bounds = array<i64: 8, 256>}, {transform_indices = @transform_3, window_bounds = array<i64: 2, 256>}]} {
    %c0 = arith.constant 0 : index
    %c0_0 = arith.constant 0 : index
    %0 = vector.load %arg1[%c0, %c0_0] : memref<2x2048xf32, #tpu.memory_space<vmem>>, vector<2x2048xf32>
    %1 = arith.truncf %0 : vector<2x2048xf32> to vector<2x2048xbf16>
    %c0_1 = arith.constant 0 : index
    %c0_2 = arith.constant 0 : index
    %2 = vector.load %arg2[%c0_1, %c0_2] : memref<2048x256xbf16, #tpu.memory_space<vmem>>, vector<2048x256xbf16>
    %cst = arith.constant dense<0.000000e+00> : vector<2x256xf32>
    %3 = tpu.matmul %1, %2, %cst {dimension_numbers = #tpu.dot_dimension_numbers<[1], [0], [0], [1], [0, 0, 1, 1], [], []>} : vector<2x2048xbf16>, vector<2048x256xbf16>, vector<2x256xf32> -> vector<2x256xf32>
    %c0_3 = arith.constant 0 : index
    %c0_4 = arith.constant 0 : index
    %4 = vector.load %arg3[%c0_3, %c0_4] : memref<8x256xf32, #tpu.memory_space<vmem>>, vector<8x256xf32>
    %5 = vector.extract_strided_slice %4 {offsets = [0, 0], sizes = [1, 256], strides = [1, 1]} : vector<8x256xf32> to vector<1x256xf32>
    %6 = vector.broadcast %5 : vector<1x256xf32> to vector<2x256xf32>
    %7 = arith.addf %3, %6 : vector<2x256xf32>
    %cst_5 = arith.constant 0.000000e+00 : f32
    %8 = vector.broadcast %cst_5 : f32 to vector<2x256xf32>
    %9 = arith.maximumf %7, %8 : vector<2x256xf32>
    %cst_6 = arith.constant dense<0.000000e+00> : vector<256xf32>
    %10 = vector.multi_reduction <add>, %9, %cst_6 [0] : vector<2x256xf32> to vector<256xf32>
    %11 = vector.shape_cast %10 : vector<256xf32> to vector<1x256xf32>
    %cst_7 = arith.constant 2.000000e+00 : f32
    %12 = vector.broadcast %cst_7 : f32 to vector<1x256xf32>
    %13 = arith.divf %11, %12 : vector<1x256xf32>
    %14 = vector.broadcast %13 : vector<1x256xf32> to vector<2x256xf32>
    %15 = arith.subf %9, %14 : vector<2x256xf32>
    %16 = arith.mulf %15, %15 : vector<2x256xf32>
    %cst_8 = arith.constant dense<0.000000e+00> : vector<256xf32>
    %17 = vector.multi_reduction <add>, %16, %cst_8 [0] : vector<2x256xf32> to vector<256xf32>
    %18 = vector.shape_cast %17 : vector<256xf32> to vector<1x256xf32>
    %cst_9 = arith.constant 2.000000e+00 : f32
    %19 = vector.broadcast %cst_9 : f32 to vector<1x256xf32>
    %20 = arith.divf %18, %19 : vector<1x256xf32>
    %21 = vector.broadcast %13 : vector<1x256xf32> to vector<2x256xf32>
    %22 = arith.subf %9, %21 : vector<2x256xf32>
    %cst_10 = arith.constant 9.99999974E-6 : f32
    %23 = vector.broadcast %cst_10 : f32 to vector<1x256xf32>
    %24 = arith.addf %20, %23 : vector<1x256xf32>
    %25 = math.rsqrt %24 : vector<1x256xf32>
    %26 = vector.broadcast %25 : vector<1x256xf32> to vector<2x256xf32>
    %27 = arith.mulf %22, %26 : vector<2x256xf32>
    %28 = vector.extract_strided_slice %4 {offsets = [1, 0], sizes = [1, 256], strides = [1, 1]} : vector<8x256xf32> to vector<1x256xf32>
    %29 = vector.broadcast %28 : vector<1x256xf32> to vector<2x256xf32>
    %30 = arith.mulf %27, %29 : vector<2x256xf32>
    %31 = vector.extract_strided_slice %4 {offsets = [2, 0], sizes = [1, 256], strides = [1, 1]} : vector<8x256xf32> to vector<1x256xf32>
    %32 = vector.broadcast %31 : vector<1x256xf32> to vector<2x256xf32>
    %33 = arith.addf %30, %32 : vector<2x256xf32>
    %c0_11 = arith.constant 0 : index
    %c0_12 = arith.constant 0 : index
    %34 = vector.load %arg4[%c0_11, %c0_12] : memref<2x256xf32, #tpu.memory_space<vmem>>, vector<2x256xf32>
    tpu.vector_store %arg4[%c0_11, %c0_12], %33 {strides = array<i32>} : memref<2x256xf32, #tpu.memory_space<vmem>>, vector<2x256xf32>,
    return
  }
  func.func @transform_0(%arg0: i32) -> (i32, i32) {
    %c0_i32 = arith.constant 0 : i32
    %c0_i32_0 = arith.constant 0 : i32
    %c0_i32_1 = arith.constant 0 : i32
    return %c0_i32, %c0_i32_0 : i32, i32
  }
  func.func @transform_1(%arg0: i32) -> (i32, i32) {
    %c0_i32 = arith.constant 0 : i32
    %c0_i32_0 = arith.constant 0 : i32
    return %c0_i32, %arg0 : i32, i32
  }
  func.func @transform_2(%arg0: i32) -> (i32, i32) {
    %c0_i32 = arith.constant 0 : i32
    %c0_i32_0 = arith.constant 0 : i32
    return %c0_i32, %arg0 : i32, i32
  }
  func.func @transform_3(%arg0: i32) -> (i32, i32) {
    %c0_i32 = arith.constant 0 : i32
    %c0_i32_0 = arith.constant 0 : i32
    return %c0_i32, %arg0 : i32, i32
  }
}

</mosaic_0001>

<bundles_post_ra>
// kernel: tpu_custom_call.1
= control target key start
LH: loop header
LB: loop body
LE: loop exit
PB: predicated region body
PF: predicated region fallthrough
CT: control target
= control target key end

     0   :  { %8 = vsyncpa [#allocation3], 0  ;;  %s2975_s0 = inlined_call_operand.hbm [shape: f32[2,2048], index: 0, kind: input, shape index: {}]   ;;  %s2976_s1 = inlined_call_operand.hbm [shape: bf16[2048,256], index: 1, kind: input, shape index: {}]   ;;  %s2977_s2 = inlined_call_operand.hbm [shape: f32[8,256], index: 2, kind: input, shape index: {}]   ;;  %s2978_s3 = inlined_call_operand.hbm [shape: f32[2,256], index: 3, kind: output, shape index: {}]  }
   0x1   :  { %9 = vsyncpa [#allocation6], 0 }
   0x2   :  { %10 = vsyncpa [#allocation4], 0  ;;  %s2870_s12 = smov [#allocation5]  }
   0x3   :  { %s26_s13 = sshll.u32 %s2870_s12, 4  ;;  %s27_s13 = int_to_ptr.vmem [resolvable:$true] %s26_s13 }
   0x4   :  { %s2792_s14 = scalar_lea.vmem %s27_s13, 32768  ;;  %p2797_p1 = scmp.lt.s32.totalorder %s27_s13, %s27_s13 }
   0x5   :  { %p2793_p0 = scmp.ne.s32.totalorder %s27_s13, %s2792_s14  ;;  %p2798_p2 = scmp.lt.s32.totalorder %s2792_s14, %s2792_s14 }
   0x7   :  { %p2799_p3 = por %p2798_p2, %p2797_p1 }
   0x9   :  { %p2800_p4 = pnand %p2799_p3, %p2793_p0 }
   0xb   :  { %2803 = shalt.err (!%p2800_p4)
}
   0xc   :  { %s2871_s15 = smov 128   ;;  %s2872_s16 = smov 8  }
   0xd   :  { %32 = dma.hbm_to_vmem [thread:$0]  %s2976_s1, 32768, %s27_s13, [#allocation6], %s2871_s15, %s2871_s15, %s2872_s16  }
   0xe   :  { %s2873_s19 = smov [#allocation2]   ;;  %s2874_s21 = smov [#allocation7]  }
   0xf   :  { %s17_s20 = sshll.u32 %s2873_s19, 4  ;;  %s39_s22 = sshll.u32 %s2874_s21, 4  ;;  %s18_s20 = int_to_ptr.vmem [resolvable:$true] %s17_s20  ;;  %s40_s22 = int_to_ptr.vmem [resolvable:$true] %s39_s22 }
  0x10   :  { %s2812_s23 = scalar_lea.vmem %s18_s20, 512  ;;  %p2817_p6 = scmp.lt.s32.totalorder %s18_s20, %s18_s20 }
  0x11   :  { %p2813_p5 = scmp.ne.s32.totalorder %s18_s20, %s2812_s23  ;;  %p2818_p7 = scmp.lt.s32.totalorder %s2812_s23, %s2812_s23 }
  0x13   :  { %p2819_p8 = por %p2818_p7, %p2817_p6 }
  0x15   :  { %p2820_p9 = pnand %p2819_p8, %p2813_p5 }
  0x17   :  { %2823 = shalt.err (!%p2820_p9)
}
  0x18   :  { %20 = dma.hbm_to_vmem [thread:$0]  %s2975_s0, 512, %s18_s20, [#allocation3]  }
  0x19   :  { %s2832_s26 = scalar_lea.vmem %s40_s22, 256  ;;  %p2837_p11 = scmp.lt.s32.totalorder %s40_s22, %s40_s22 }
  0x1a   :  { %p2833_p10 = scmp.ne.s32.totalorder %s40_s22, %s2832_s26  ;;  %p2838_p12 = scmp.lt.s32.totalorder %s2832_s26, %s2832_s26 }
  0x1c   :  { %p2839_p13 = por %p2838_p12, %p2837_p11 }
  0x1e   :  { %p2840_p0 = pnand %p2839_p13, %p2833_p10 }
  0x20   :  { %2843 = shalt.err (!%p2840_p0)
}
  0x21   :  { %42 = dma.hbm_to_vmem [thread:$0]  %s2977_s2, 256, %s40_s22, [#allocation6]  }
  0x22   :  { %2864 = dma.done.wait [#allocation3], 512  }
  0x23   :  { %2865 = vsyncadd [#allocation3], 4294966784 }
  0x24   :  { %2866 = dma.done.wait [#allocation6], 33024  }
  0x25   :  { %2867 = vsyncadd [#allocation6], 4294934272  ;;  %v2392_v0 = vld [vmem:[#allocation5 + $0x74] ss:$8 sps:$4 sm:$0xff]   ;;  %v2396_v2 = vld [vmem:[#allocation5 + $0x70] ss:$8 sps:$4 sm:$0xff]   ;;  %v64_v38 = vlaneseq }
  0x26   :  { %v2394_v1 = vld [vmem:[#allocation5 + $0x174] ss:$8 sps:$4 sm:$0xff]   ;;  %1706 = vmatprep.subr.bf16.mxu0 %v2392_v0  ;;  %v2397_v3 = vld [vmem:[#allocation5 + $0x170] ss:$8 sps:$4 sm:$0xff]   ;;  %v2398_v4 = vld [vmem:[#allocation5 + $0x64] ss:$8 sps:$4 sm:$0xff]  }
  0x27   :  { %1747 = vmatprep.subr.bf16.mxu1 %v2394_v1  ;;  %1707 = vmatpush1.bf16.msra.mxu0 %v2396_v2  ;;  %v2400_v5 = vld [vmem:[#allocation5 + $0x164] ss:$8 sps:$4 sm:$0xff]   ;;  %v2402_v6 = vld [vmem:[#allocation5 + $0x60] ss:$8 sps:$4 sm:$0xff]   ;;  %v2404_v8 = vld [vmem:[#allocation5 + $0x54] ss:$8 sps:$4 sm:$0xff]  }
  0x28   :  { %1748 = vmatpush1.bf16.msra.mxu1 %v2397_v3  ;;  %1708 = vmatprep.subr.bf16.mxu0 %v2398_v4  ;;  %v2403_v7 = vld [vmem:[#allocation5 + $0x160] ss:$8 sps:$4 sm:$0xff]   ;;  %v2406_v9 = vld [vmem:[#allocation5 + $0x154] ss:$8 sps:$4 sm:$0xff]   ;;  %v2408_v10 = vld [vmem:[#allocation5 + $0x50] ss:$8 sps:$4 sm:$0xff]  }
  0x29   :  { %1749 = vmatprep.subr.bf16.mxu1 %v2400_v5  ;;  %v2409_v11 = vld [vmem:[#allocation5 + $0x150] ss:$8 sps:$4 sm:$0xff]   ;;  %v2410_v12 = vld [vmem:[#allocation5 + $0x44] ss:$8 sps:$4 sm:$0xff]   ;;  %v2414_v14 = vld [vmem:[#allocation5 + $0x40] ss:$8 sps:$4 sm:$0xff]  }
  0x2a   :  { %v2412_v13 = vld [vmem:[#allocation5 + $0x144] ss:$8 sps:$4 sm:$0xff]   ;;  %v2415_v15 = vld [vmem:[#allocation5 + $0x140] ss:$8 sps:$4 sm:$0xff]   ;;  %v2416_v16 = vld [vmem:[#allocation5 + $0x34] ss:$8 sps:$4 sm:$0xff]  }
  0x2b   :  { %1709 = vmatpush1.bf16.msra.mxu0 %v2402_v6  ;;  %v2418_v17 = vld [vmem:[#allocation5 + $0x134] ss:$8 sps:$4 sm:$0xff]   ;;  %v2420_v18 = vld [vmem:[#allocation5 + $0x30] ss:$8 sps:$4 sm:$0xff]   ;;  %v2422_v20 = vld [vmem:[#allocation5 + $0x24] ss:$8 sps:$4 sm:$0xff]  }
  0x2c   :  { %1750 = vmatpush1.bf16.msra.mxu1 %v2403_v7  ;;  %1710 = vmatprep.subr.bf16.mxu0 %v2404_v8  ;;  %v2421_v19 = vld [vmem:[#allocation5 + $0x130] ss:$8 sps:$4 sm:$0xff]   ;;  %v2424_v21 = vld [vmem:[#allocation5 + $0x124] ss:$8 sps:$4 sm:$0xff]   ;;  %v2426_v22 = vld [vmem:[#allocation5 + $0x20] ss:$8 sps:$4 sm:$0xff]  }
  0x2d   :  { %1751 = vmatprep.subr.bf16.mxu1 %v2406_v9  ;;  %v2427_v23 = vld [vmem:[#allocation5 + $0x120] ss:$8 sps:$4 sm:$0xff]   ;;  %v2428_v24 = vld [vmem:[#allocation5 + $0x14] ss:$8 sps:$4 sm:$0xff]   ;;  %v2432_v26 = vld [vmem:[#allocation5 + $0x10] ss:$8 sps:$4 sm:$0xff]  }
  0x2e   :  { %v2430_v25 = vld [vmem:[#allocation5 + $0x114] ss:$8 sps:$4 sm:$0xff]   ;;  %v2433_v27 = vld [vmem:[#allocation5 + $0x110] ss:$8 sps:$4 sm:$0xff]   ;;  %v2434_v28 = vld [vmem:[#allocation5 + $0x4] ss:$8 sps:$4 sm:$0xff]  }
  0x2f   :  { %1711 = vmatpush1.bf16.msra.mxu0 %v2408_v10  ;;  %v2436_v29 = vld [vmem:[#allocation5 + $0x104] ss:$8 sps:$4 sm:$0xff]   ;;  %v2438_v30 = vld [vmem:[#allocation5] ss:$8 sps:$4 sm:$0xff]   ;;  %v2440_v32 = vld [vmem:[#allocation5 + $0xf4] ss:$8 sps:$4 sm:$0xff]  }
  0x30   :  { %1752 = vmatpush1.bf16.msra.mxu1 %v2409_v11  ;;  %1712 = vmatprep.subr.bf16.mxu0 %v2410_v12  ;;  %v2439_v31 = vld [vmem:[#allocation5 + $0x100] ss:$8 sps:$4 sm:$0xff]   ;;  %v2442_v33 = vld [vmem:[#allocation5 + $0x1f4] ss:$8 sps:$4 sm:$0xff]   ;;  %v2444_v34 = vld [vmem:[#allocation5 + $0xf0] ss:$8 sps:$4 sm:$0xff]  }
  0x31   :  { %1753 = vmatprep.subr.bf16.mxu1 %v2412_v13  ;;  %v2445_v35 = vld [vmem:[#allocation5 + $0x1f0] ss:$8 sps:$4 sm:$0xff]   ;;  %v2875_v36 = vmov 1983009808   ;;  %v2446_v39 = vld [vmem:[#allocation5 + $0xe4] ss:$8 sps:$4 sm:$0xff]  }
  0x32   :  { %v62_v37 = vunpack.c.l.s4 %v2875_v36  ;;  %v2448_v40 = vld [vmem:[#allocation5 + $0x1e4] ss:$8 sps:$4 sm:$0xff]   ;;  %v2450_v41 = vld [vmem:[#allocation5 + $0xe0] ss:$8 sps:$4 sm:$0xff]   ;;  %v2906_v43 = vshrl.u32 %v64_v38, 7  ;;  %vm2036_vm0 = vcmask 1041408  }
  0x33   :  { %1713 = vmatpush1.bf16.msra.mxu0 %v2414_v14  ;;  %v2451_v44 = vld [vmem:[#allocation5 + $0x1e0] ss:$8 sps:$4 sm:$0xff]   ;;  %v2452_v45 = vld [vmem:[#allocation5 + $0xd4] ss:$8 sps:$4 sm:$0xff]   ;;  %v2456_v47 = vld [vmem:[#allocation5 + $0xd0] ss:$8 sps:$4 sm:$0xff]  }
  0x34   :  { %1754 = vmatpush1.bf16.msra.mxu1 %v2415_v15  ;;  %1714 = vmatprep.subr.bf16.mxu0 %v2416_v16  ;;  %v63_v42 = vunpack.c.0.s8 %v62_v37  ;;  %v2454_v46 = vld [vmem:[#allocation5 + $0x1d4] ss:$8 sps:$4 sm:$0xff]   ;;  %v2457_v48 = vld [vmem:[#allocation5 + $0x1d0] ss:$8 sps:$4 sm:$0xff]   ;;  %v2458_v50 = vld [vmem:[#allocation5 + $0xc4] ss:$8 sps:$4 sm:$0xff]  }
  0x35   :  { %1755 = vmatprep.subr.bf16.mxu1 %v2418_v17  ;;  %v2460_v51 = vld [vmem:[#allocation5 + $0x1c4] ss:$8 sps:$4 sm:$0xff]   ;;  %v2462_v53 = vld [vmem:[#allocation5 + $0xc0] ss:$8 sps:$4 sm:$0xff]   ;;  %v2464_v57 = vld [vmem:[#allocation5 + $0xb4] ss:$8 sps:$4 sm:$0xff]  }
  0x36   :  { %v2909_v49 = vsub.s32 %v63_v42, %v2906_v43  ;;  %v52_v52 = vld [vmem:[#allocation2] sm:$0xff]  ;;  %v2466_v58 = vld [vmem:[#allocation5 + $0x1b4] ss:$8 sps:$4 sm:$0xff]   ;;  %v2468_v61 = vld [vmem:[#allocation5 + $0xb0] ss:$8 sps:$4 sm:$0xff]   ;;  %s2876_s0 = smov [#allocation8]  }
  0x37   :  { %1715 = vmatpush1.bf16.msra.mxu0 %v2420_v18  ;;  %v60_v55 = vcombine.high %v52_v52, %v52_v52  ;;  %v2463_v56 = vld [vmem:[#allocation5 + $0x1c0] ss:$8 sps:$4 sm:$0xff]   ;;  %v2469_v0 = vld [vmem:[#allocation5 + $0x1b0] ss:$8 sps:$4 sm:$0xff]   ;;  %v2470_v1 = vld [vmem:[#allocation5 + $0xa4] ss:$8 sps:$4 sm:$0xff]  }
  0x38   :  { %1756 = vmatpush1.bf16.msra.mxu1 %v2421_v19  ;;  %1716 = vmatprep.subr.bf16.mxu0 %v2422_v20  ;;  %v67_v54 = vrot.slane %v52_v52, %v2909_v49  ;;  %v2472_v2 = vld [vmem:[#allocation5 + $0x1a4] ss:$8 sps:$4 sm:$0xff]   ;;  %v2474_v4 = vld [vmem:[#allocation5 + $0xa0] ss:$8 sps:$4 sm:$0xff]   ;;  %v2476_v6 = vld [vmem:[#allocation5 + $0x94] ss:$8 sps:$4 sm:$0xff]  }
  0x39   :  { %1757 = vmatprep.subr.bf16.mxu1 %v2424_v21  ;;  %v74_v60 = vrot.slane %v60_v55, %v2909_v49  ;;  %v2475_v5 = vld [vmem:[#allocation5 + $0x1a0] ss:$8 sps:$4 sm:$0xff]   ;;  %v2478_v7 = vld [vmem:[#allocation5 + $0x194] ss:$8 sps:$4 sm:$0xff]   ;;  %v2480_v8 = vld [vmem:[#allocation5 + $0x90] ss:$8 sps:$4 sm:$0xff]  }
  0x3a   :  { %v75_v59 = vcombine.high %v67_v54, %v67_v54  ;;  %v2481_v9 = vld [vmem:[#allocation5 + $0x190] ss:$8 sps:$4 sm:$0xff]   ;;  %v2482_v10 = vld [vmem:[#allocation5 + $0x84] ss:$8 sps:$4 sm:$0xff]   ;;  %v2486_v12 = vld [vmem:[#allocation5 + $0x80] ss:$8 sps:$4 sm:$0xff]   ;;  %v144_v16 = vpack.c.bf16 %v67_v54, %v67_v54 }
  0x3b   :  { %1717 = vmatpush1.bf16.msra.mxu0 %v2426_v22  ;;  %v76_v63 = vcombine.high %v74_v60, %v74_v60  ;;  %v2484_v11 = vld [vmem:[#allocation5 + $0x184] ss:$8 sps:$4 sm:$0xff]   ;;  %v2487_v13 = vld [vmem:[#allocation5 + $0x180] ss:$8 sps:$4 sm:$0xff]   ;;  %v2491_v14 = vld [vmem:[#allocation5 + $0x274] ss:$8 sps:$4 sm:$0xff]   ;;  %v146_v17 = vpack.c.bf16 %v74_v60, %v74_v60 }
  0x3c   :  { %1758 = vmatpush1.bf16.msra.mxu1 %v2427_v23  ;;  %1718 = vmatprep.subr.bf16.mxu0 %v2428_v24  ;;  %v145_v62 = vpack.c.bf16 %v75_v59, %v75_v59  ;;  %v2494_v15 = vld [vmem:[#allocation5 + $0x374] ss:$8 sps:$4 sm:$0xff]   ;;  %v2489_v18 = vld [vmem:[#allocation5 + $0x270] ss:$8 sps:$4 sm:$0xff]   ;;  %v2497_v20 = vld [vmem:[#allocation5 + $0x264] ss:$8 sps:$4 sm:$0xff]  }
  0x3d   :  { %1759 = vmatprep.subr.bf16.mxu1 %v2430_v25  ;;  %v147_v3 = vpack.c.bf16 %v76_v63, %v76_v63  ;;  %v2492_v19 = vld [vmem:[#allocation5 + $0x370] ss:$8 sps:$4 sm:$0xff]   ;;  %v2500_v21 = vld [vmem:[#allocation5 + $0x364] ss:$8 sps:$4 sm:$0xff]   ;;  %v2495_v22 = vld [vmem:[#allocation5 + $0x260] ss:$8 sps:$4 sm:$0xff]  }
  0x3e   :  { %1738 = vmatprep.mubr.bf16.mxu0 %v145_v62  ;;  %v2498_v23 = vld [vmem:[#allocation5 + $0x360] ss:$8 sps:$4 sm:$0xff]   ;;  %v2503_v24 = vld [vmem:[#allocation5 + $0x254] ss:$8 sps:$4 sm:$0xff]   ;;  %v2521_v36 = vld [vmem:[#allocation5 + $0x224] ss:$8 sps:$4 sm:$0xff]  }
  0x3f   :  { %1719 = vmatpush1.bf16.msra.mxu0 %v2432_v26  ;;  %1779 = vmatprep.mubr.bf16.mxu1 %v147_v3  ;;  %v2506_v25 = vld [vmem:[#allocation5 + $0x354] ss:$8 sps:$4 sm:$0xff]   ;;  %v2501_v26 = vld [vmem:[#allocation5 + $0x250] ss:$8 sps:$4 sm:$0xff]   ;;  %v2524_v37 = vld [vmem:[#allocation5 + $0x324] ss:$8 sps:$4 sm:$0xff]  }
  0x40   :  { %1760 = vmatpush1.bf16.msra.mxu1 %v2433_v27  ;;  %1720 = vmatprep.subr.bf16.mxu0 %v2434_v28  ;;  %v2504_v27 = vld [vmem:[#allocation5 + $0x350] ss:$8 sps:$4 sm:$0xff]   ;;  %v2509_v28 = vld [vmem:[#allocation5 + $0x244] ss:$8 sps:$4 sm:$0xff]   ;;  %v2519_v38 = vld [vmem:[#allocation5 + $0x220] ss:$8 sps:$4 sm:$0xff]  }
  0x41   :  { %1761 = vmatprep.subr.bf16.mxu1 %v2436_v29  ;;  %v2512_v29 = vld [vmem:[#allocation5 + $0x344] ss:$8 sps:$4 sm:$0xff]   ;;  %v2531_v55 = vld [vmem:[#allocation5 + $0x200] ss:$8 sps:$4 sm:$0xff]   ;;  %v2542_v59 = vld [vmem:[#allocation5 + $0x3f4] ss:$8 sps:$4 sm:$0xff]  }
  0x42   :  { %v53_v42 = vld [vmem:[#allocation2 + $0x8] sm:$0xff]  ;;  %v2537_v60 = vld [vmem:[#allocation5 + $0x2f0] ss:$8 sps:$4 sm:$0xff]   ;;  %v2554_v3 = vld [vmem:[#allocation5 + $0x3d4] ss:$8 sps:$4 sm:$0xff]   ;;  %s2118_s2 = sshll.u32 %s2876_s0, 4  ;;  %s2119_s2 = int_to_ptr.vmem [resolvable:$true] %s2118_s2 }
  0x43   :  { %1721 = vmatpush1.bf16.msra.mxu0 %v2438_v30  ;;  %v2507_v30 = vld [vmem:[#allocation5 + $0x240] ss:$8 sps:$4 sm:$0xff]   ;;  %v2536_v52 = vld [vmem:[#allocation5 + $0x304] ss:$8 sps:$4 sm:$0xff]   ;;  %s2844_s28 = scalar_lea.vmem %s2119_s2, 64  ;;  %p2849_p2 = scmp.lt.s32.totalorder %s2119_s2, %s2119_s2 }
  0x44   :  { %1762 = vmatpush1.bf16.msra.mxu1 %v2439_v31  ;;  %1722 = vmatprep.subr.bf16.mxu0 %v2440_v32  ;;  %v2510_v31 = vld [vmem:[#allocation5 + $0x340] ss:$8 sps:$4 sm:$0xff]   ;;  %v2515_v32 = vld [vmem:[#allocation5 + $0x234] ss:$8 sps:$4 sm:$0xff]   ;;  %v2545_v62 = vld [vmem:[#allocation5 + $0x2e4] ss:$8 sps:$4 sm:$0xff]   ;;  %p2845_p1 = scmp.ne.s32.totalorder %s2119_s2, %s2844_s28  ;;  %p2850_p3 = scmp.lt.s32.totalorder %s2844_s28, %s2844_s28 }
  0x45   :  { %1763 = vmatprep.subr.bf16.mxu1 %v2442_v33  ;;  %v2518_v33 = vld [vmem:[#allocation5 + $0x334] ss:$8 sps:$4 sm:$0xff]   ;;  %v2548_v63 = vld [vmem:[#allocation5 + $0x3e4] ss:$8 sps:$4 sm:$0xff]  }
  0x46   :  { %p2851_p4 = por %p2850_p3, %p2849_p2 }
  0x47   :  { %1723 = vmatpush2.bf16.msra.mxu0 %v2444_v34  ;;  %v2513_v34 = vld [vmem:[#allocation5 + $0x230] ss:$8 sps:$4 sm:$0xff]  }
  0x48   :  { %1764 = vmatpush2.bf16.msra.mxu1 %v2445_v35  ;;  %1724 = vmatprep.subr.bf16.mxu0 %v2446_v39  ;;  %v2516_v35 = vld [vmem:[#allocation5 + $0x330] ss:$8 sps:$4 sm:$0xff]   ;;  %v2522_v39 = vld [vmem:[#allocation5 + $0x320] ss:$8 sps:$4 sm:$0xff]   ;;  %p2852_p5 = pnand %p2851_p4, %p2845_p1 }
  0x49   :  { %1765 = vmatprep.subr.bf16.mxu1 %v2448_v40  ;;  %v2527_v40 = vld [vmem:[#allocation5 + $0x214] ss:$8 sps:$4 sm:$0xff]  }
  0x4b   :  { %1725 = vmatpush2.bf16.msra.mxu0 %v2450_v41  ;;  %v2530_v41 = vld [vmem:[#allocation5 + $0x314] ss:$8 sps:$4 sm:$0xff]  }
  0x4c   :  { %1766 = vmatpush2.bf16.msra.mxu1 %v2451_v44  ;;  %1726 = vmatprep.subr.bf16.mxu0 %v2452_v45  ;;  %v2914_v44 = vrot.slane %v53_v42, %v2909_v49  ;;  %v77_v45 = vcombine.high %v53_v42, %v53_v42  ;;  %v2603_v42 = vld [vmem:[#allocation5 + $0x554] ss:$8 sps:$4 sm:$0xff]  }
  0x4d   :  { %1767 = vmatprep.subr.bf16.mxu1 %v2454_v46  ;;  %v2525_v46 = vld [vmem:[#allocation5 + $0x210] ss:$8 sps:$4 sm:$0xff]  }
  0x4f   :  { %1727 = vmatpush2.bf16.msra.mxu0 %v2456_v47  ;;  %v2528_v47 = vld [vmem:[#allocation5 + $0x310] ss:$8 sps:$4 sm:$0xff]  }
  0x50   :  { %1768 = vmatpush2.bf16.msra.mxu1 %v2457_v48  ;;  %1728 = vmatprep.subr.bf16.mxu0 %v2458_v50  ;;  %v92_v48 = vcombine.high %v2914_v44, %v2914_v44  ;;  %v2919_v50 = vrot.slane %v77_v45, %v2909_v49 }
  0x51   :  { %1769 = vmatprep.subr.bf16.mxu1 %v2460_v51  ;;  %v2533_v51 = vld [vmem:[#allocation5 + $0x204] ss:$8 sps:$4 sm:$0xff]  }
  0x52   :  { %v93_v54 = vcombine.high %v2919_v50, %v2919_v50 }
  0x53   :  { %1729 = vmatpush2.bf16.msra.mxu0 %v2462_v53  ;;  %v149_v53 = vpack.c.bf16 %v92_v48, %v92_v48  ;;  %v2601_v48 = vld [vmem:[#allocation5 + $0x550] ss:$8 sps:$4 sm:$0xff]  }
  0x54   :  { %1770 = vmatpush2.bf16.msra.mxu1 %v2463_v56  ;;  %1730 = vmatprep.subr.bf16.mxu0 %v2464_v57  ;;  %v2534_v56 = vld [vmem:[#allocation5 + $0x300] ss:$8 sps:$4 sm:$0xff]   ;;  %v151_v57 = vpack.c.bf16 %v93_v54, %v93_v54  ;;  %v2612_v54 = vld [vmem:[#allocation5 + $0x434] ss:$8 sps:$4 sm:$0xff]  }
  0x55   :  { %1771 = vmatprep.subr.bf16.mxu1 %v2466_v58  ;;  %v2539_v58 = vld [vmem:[#allocation5 + $0x2f4] ss:$8 sps:$4 sm:$0xff]  }
  0x57   :  { %1731 = vmatpush2.bf16.msra.mxu0 %v2468_v61  ;;  %v2540_v61 = vld [vmem:[#allocation5 + $0x3f0] ss:$8 sps:$4 sm:$0xff]  }
  0x58   :  { %1772 = vmatpush2.bf16.msra.mxu1 %v2469_v0  ;;  %1732 = vmatprep.subr.bf16.mxu0 %v2470_v1  ;;  %v2543_v0 = vld [vmem:[#allocation5 + $0x2e0] ss:$8 sps:$4 sm:$0xff]  }
  0x59   :  { %1773 = vmatprep.subr.bf16.mxu1 %v2472_v2  ;;  %v2546_v1 = vld [vmem:[#allocation5 + $0x3e0] ss:$8 sps:$4 sm:$0xff]   ;;  %v2551_v2 = vld [vmem:[#allocation5 + $0x2d4] ss:$8 sps:$4 sm:$0xff]  }
  0x5b   :  { %1733 = vmatpush2.bf16.msra.mxu0 %v2474_v4  ;;  %v2549_v4 = vld [vmem:[#allocation5 + $0x2d0] ss:$8 sps:$4 sm:$0xff]  }
  0x5c   :  { %1774 = vmatpush2.bf16.msra.mxu1 %v2475_v5  ;;  %1734 = vmatprep.subr.bf16.mxu0 %v2476_v6  ;;  %v2552_v5 = vld [vmem:[#allocation5 + $0x3d0] ss:$8 sps:$4 sm:$0xff]   ;;  %v2557_v6 = vld [vmem:[#allocation5 + $0x2c4] ss:$8 sps:$4 sm:$0xff]  }
  0x5d   :  { %1775 = vmatprep.subr.bf16.mxu1 %v2478_v7  ;;  %v2560_v7 = vld [vmem:[#allocation5 + $0x3c4] ss:$8 sps:$4 sm:$0xff]  }
  0x5f   :  { %1735 = vmatpush2.bf16.msra.mxu0 %v2480_v8  ;;  %v2555_v8 = vld [vmem:[#allocation5 + $0x2c0] ss:$8 sps:$4 sm:$0xff]  }
  0x60   :  { %1776 = vmatpush2.bf16.msra.mxu1 %v2481_v9  ;;  %1736 = vmatprep.subr.bf16.mxu0 %v2482_v10  ;;  %v2558_v9 = vld [vmem:[#allocation5 + $0x3c0] ss:$8 sps:$4 sm:$0xff]   ;;  %v2563_v10 = vld [vmem:[#allocation5 + $0x2b4] ss:$8 sps:$4 sm:$0xff]  }
  0x61   :  { %1777 = vmatprep.subr.bf16.mxu1 %v2484_v11  ;;  %v2566_v11 = vld [vmem:[#allocation5 + $0x3b4] ss:$8 sps:$4 sm:$0xff]  }
  0x63   :  { %1737 = vmatpush2.bf16.msra.mxu0 %v2486_v12  ;;  %v2561_v12 = vld [vmem:[#allocation5 + $0x2b0] ss:$8 sps:$4 sm:$0xff]  }
  0x64   :  { %1778 = vmatpush2.bf16.msra.mxu1 %v2487_v13  ;;  %1788 = vmatprep.subr.bf16.mxu0 %v2491_v14  ;;  %v2564_v13 = vld [vmem:[#allocation5 + $0x3b0] ss:$8 sps:$4 sm:$0xff]   ;;  %v2569_v14 = vld [vmem:[#allocation5 + $0x2a4] ss:$8 sps:$4 sm:$0xff]  }
  0x65   :  { %1829 = vmatprep.subr.bf16.mxu1 %v2494_v15  ;;  %v2572_v15 = vld [vmem:[#allocation5 + $0x3a4] ss:$8 sps:$4 sm:$0xff]  }
  0x66   :  { %1739 = vmatmul.mubr.bf16.vlgmr.msra.gmra.mxu0 %v144_v16  ;;  %v2567_v16 = vld [vmem:[#allocation5 + $0x2a0] ss:$8 sps:$4 sm:$0xff]  }
  0x67   :  { %1780 = vmatmul.mubr.bf16.vlgmr.msra.gmra.mxu1 %v146_v17  ;;  %1789 = vmatpush1.bf16.msra.mxu0 %v2489_v18  ;;  %v2570_v17 = vld [vmem:[#allocation5 + $0x3a0] ss:$8 sps:$4 sm:$0xff]   ;;  %v2575_v18 = vld [vmem:[#allocation5 + $0x294] ss:$8 sps:$4 sm:$0xff]  }
  0x68   :  { %1830 = vmatpush1.bf16.msra.mxu1 %v2492_v19  ;;  %1790 = vmatprep.subr.bf16.mxu0 %v2497_v20  ;;  %v2578_v19 = vld [vmem:[#allocation5 + $0x394] ss:$8 sps:$4 sm:$0xff]   ;;  %v2573_v20 = vld [vmem:[#allocation5 + $0x290] ss:$8 sps:$4 sm:$0xff]  }
  0x69   :  { %1831 = vmatprep.subr.bf16.mxu1 %v2500_v21  ;;  %1820 = vmatprep.mubr.bf16.mxu0 %v149_v53  ;;  %v2576_v21 = vld [vmem:[#allocation5 + $0x390] ss:$8 sps:$4 sm:$0xff]   ;;  %v2607_v53 = vld [vmem:[#allocation5 + $0x540] ss:$8 sps:$4 sm:$0xff]  }
  0x6a   :  { %1861 = vmatprep.mubr.bf16.mxu1 %v151_v57  ;;  %v2613_v57 = vld [vmem:[#allocation5 + $0x530] ss:$8 sps:$4 sm:$0xff]  }
  0x6b   :  { %1791 = vmatpush1.bf16.msra.mxu0 %v2495_v22  ;;  %v2581_v22 = vld [vmem:[#allocation5 + $0x284] ss:$8 sps:$4 sm:$0xff]  }
  0x6c   :  { %1832 = vmatpush1.bf16.msra.mxu1 %v2498_v23  ;;  %1792 = vmatprep.subr.bf16.mxu0 %v2503_v24  ;;  %v2584_v23 = vld [vmem:[#allocation5 + $0x384] ss:$8 sps:$4 sm:$0xff]   ;;  %v2579_v24 = vld [vmem:[#allocation5 + $0x280] ss:$8 sps:$4 sm:$0xff]  }
  0x6d   :  { %1833 = vmatprep.subr.bf16.mxu1 %v2506_v25  ;;  %v2582_v25 = vld [vmem:[#allocation5 + $0x380] ss:$8 sps:$4 sm:$0xff]  }
  0x6f   :  { %1793 = vmatpush1.bf16.msra.mxu0 %v2501_v26  ;;  %v2588_v26 = vld [vmem:[#allocation5 + $0x474] ss:$8 sps:$4 sm:$0xff]  }
  0x70   :  { %1834 = vmatpush1.bf16.msra.mxu1 %v2504_v27  ;;  %1794 = vmatprep.subr.bf16.mxu0 %v2509_v28  ;;  %v2591_v27 = vld [vmem:[#allocation5 + $0x574] ss:$8 sps:$4 sm:$0xff]   ;;  %v148_v28 = vpack.c.bf16 %v2914_v44, %v2914_v44 }
  0x71   :  { %1835 = vmatprep.subr.bf16.mxu1 %v2512_v29  ;;  %v150_v29 = vpack.c.bf16 %v2919_v50, %v2919_v50  ;;  %v2606_v50 = vld [vmem:[#allocation5 + $0x444] ss:$8 sps:$4 sm:$0xff]  }
  0x73   :  { %1795 = vmatpush1.bf16.msra.mxu0 %v2507_v30  ;;  %v2586_v30 = vld [vmem:[#allocation5 + $0x470] ss:$8 sps:$4 sm:$0xff]  }
  0x74   :  { %1836 = vmatpush1.bf16.msra.mxu1 %v2510_v31  ;;  %1796 = vmatprep.subr.bf16.mxu0 %v2515_v32  ;;  %v2589_v31 = vld [vmem:[#allocation5 + $0x570] ss:$8 sps:$4 sm:$0xff]   ;;  %v2594_v32 = vld [vmem:[#allocation5 + $0x464] ss:$8 sps:$4 sm:$0xff]  }
  0x75   :  { %1837 = vmatprep.subr.bf16.mxu1 %v2518_v33  ;;  %v54_v33 = vld [vmem:[#allocation2 + $0x10] sm:$0xff] }
  0x77   :  { %1797 = vmatpush1.bf16.msra.mxu0 %v2513_v34  ;;  %v2597_v34 = vld [vmem:[#allocation5 + $0x564] ss:$8 sps:$4 sm:$0xff]  }
  0x78   :  { %1838 = vmatpush1.bf16.msra.mxu1 %v2516_v35  ;;  %1798 = vmatprep.subr.bf16.mxu0 %v2521_v36  ;;  %v2928_v35 = vrot.slane %v54_v33, %v2909_v49  ;;  %v94_v36 = vcombine.high %v54_v33, %v54_v33 }
  0x79   :  { %1839 = vmatprep.subr.bf16.mxu1 %v2524_v37  ;;  %v2592_v37 = vld [vmem:[#allocation5 + $0x460] ss:$8 sps:$4 sm:$0xff]  }
  0x7b   :  { %1799 = vmatpush1.bf16.msra.mxu0 %v2519_v38  ;;  %v109_v38 = vcombine.high %v2928_v35, %v2928_v35 }
  0x7c   :  { %1840 = vmatpush1.bf16.msra.mxu1 %v2522_v39  ;;  %1800 = vmatprep.subr.bf16.mxu0 %v2527_v40  ;;  %v2933_v39 = vrot.slane %v94_v36, %v2909_v49  ;;  %v2595_v40 = vld [vmem:[#allocation5 + $0x560] ss:$8 sps:$4 sm:$0xff]   ;;  %v2673_v36 = vld [vmem:[#allocation5 + $0x590] ss:$8 sps:$4 sm:$0xff]  }
  0x7d   :  { %1841 = vmatprep.subr.bf16.mxu1 %v2530_v41  ;;  %v2600_v41 = vld [vmem:[#allocation5 + $0x454] ss:$8 sps:$4 sm:$0xff]   ;;  %v153_v44 = vpack.c.bf16 %v109_v38, %v109_v38  ;;  %v2681_v38 = vld [vmem:[#allocation5 + $0x584] ss:$8 sps:$4 sm:$0xff]  }
  0x7e   :  { %v110_v45 = vcombine.high %v2933_v39, %v2933_v39 }
  0x7f   :  { %1801 = vmatpush1.bf16.msra.mxu0 %v2525_v46  ;;  %v2598_v46 = vld [vmem:[#allocation5 + $0x450] ss:$8 sps:$4 sm:$0xff]  }
  0x80   :  { %1842 = vmatpush1.bf16.msra.mxu1 %v2528_v47  ;;  %1802 = vmatprep.subr.bf16.mxu0 %v2533_v51  ;;  %v155_v47 = vpack.c.bf16 %v110_v45, %v110_v45  ;;  %v2609_v51 = vld [vmem:[#allocation5 + $0x544] ss:$8 sps:$4 sm:$0xff]   ;;  %v2685_v45 = vld [vmem:[#allocation5 + $0x674] ss:$8 sps:$4 sm:$0xff]  }
  0x81   :  { %1843 = vmatprep.subr.bf16.mxu1 %v2536_v52  ;;  %v2604_v52 = vld [vmem:[#allocation5 + $0x440] ss:$8 sps:$4 sm:$0xff]  }
  0x83   :  { %1803 = vmatpush1.bf16.msra.mxu0 %v2531_v55  ;;  %v2615_v55 = vld [vmem:[#allocation5 + $0x534] ss:$8 sps:$4 sm:$0xff]  }
  0x84   :  { %1844 = vmatpush1.bf16.msra.mxu1 %v2534_v56  ;;  %1804 = vmatprep.subr.bf16.mxu0 %v2539_v58  ;;  %v2610_v56 = vld [vmem:[#allocation5 + $0x430] ss:$8 sps:$4 sm:$0xff]   ;;  %v2618_v58 = vld [vmem:[#allocation5 + $0x424] ss:$8 sps:$4 sm:$0xff]  }
  0x85   :  { %1845 = vmatprep.subr.bf16.mxu1 %v2542_v59  ;;  %v2621_v59 = vld [vmem:[#allocation5 + $0x524] ss:$8 sps:$4 sm:$0xff]  }
  0x87   :  { %1805 = vmatpush2.bf16.msra.mxu0 %v2537_v60  ;;  %v2616_v60 = vld [vmem:[#allocation5 + $0x420] ss:$8 sps:$4 sm:$0xff]  }
  0x88   :  { %1846 = vmatpush2.bf16.msra.mxu1 %v2540_v61  ;;  %1806 = vmatprep.subr.bf16.mxu0 %v2545_v62  ;;  %v2619_v61 = vld [vmem:[#allocation5 + $0x520] ss:$8 sps:$4 sm:$0xff]   ;;  %v2624_v62 = vld [vmem:[#allocation5 + $0x414] ss:$8 sps:$4 sm:$0xff]  }
  0x89   :  { %1847 = vmatprep.subr.bf16.mxu1 %v2548_v63  ;;  %v2627_v63 = vld [vmem:[#allocation5 + $0x514] ss:$8 sps:$4 sm:$0xff]  }
  0x8b   :  { %1807 = vmatpush2.bf16.msra.mxu0 %v2543_v0  ;;  %v2622_v0 = vld [vmem:[#allocation5 + $0x410] ss:$8 sps:$4 sm:$0xff]  }
  0x8c   :  { %1848 = vmatpush2.bf16.msra.mxu1 %v2546_v1  ;;  %1808 = vmatprep.subr.bf16.mxu0 %v2551_v2  ;;  %v2625_v1 = vld [vmem:[#allocation5 + $0x510] ss:$8 sps:$4 sm:$0xff]   ;;  %v2630_v2 = vld [vmem:[#allocation5 + $0x404] ss:$8 sps:$4 sm:$0xff]  }
  0x8d   :  { %1849 = vmatprep.subr.bf16.mxu1 %v2554_v3  ;;  %v2633_v3 = vld [vmem:[#allocation5 + $0x504] ss:$8 sps:$4 sm:$0xff]  }
  0x8f   :  { %1809 = vmatpush2.bf16.msra.mxu0 %v2549_v4  ;;  %v2628_v4 = vld [vmem:[#allocation5 + $0x400] ss:$8 sps:$4 sm:$0xff]  }
  0x90   :  { %1850 = vmatpush2.bf16.msra.mxu1 %v2552_v5  ;;  %1810 = vmatprep.subr.bf16.mxu0 %v2557_v6  ;;  %v2631_v5 = vld [vmem:[#allocation5 + $0x500] ss:$8 sps:$4 sm:$0xff]   ;;  %v2636_v6 = vld [vmem:[#allocation5 + $0x4f4] ss:$8 sps:$4 sm:$0xff]  }
  0x91   :  { %1851 = vmatprep.subr.bf16.mxu1 %v2560_v7  ;;  %v2639_v7 = vld [vmem:[#allocation5 + $0x5f4] ss:$8 sps:$4 sm:$0xff]  }
  0x93   :  { %1811 = vmatpush2.bf16.msra.mxu0 %v2555_v8  ;;  %v2634_v8 = vld [vmem:[#allocation5 + $0x4f0] ss:$8 sps:$4 sm:$0xff]  }
  0x94   :  { %1852 = vmatpush2.bf16.msra.mxu1 %v2558_v9  ;;  %1812 = vmatprep.subr.bf16.mxu0 %v2563_v10  ;;  %v2637_v9 = vld [vmem:[#allocation5 + $0x5f0] ss:$8 sps:$4 sm:$0xff]   ;;  %v2642_v10 = vld [vmem:[#allocation5 + $0x4e4] ss:$8 sps:$4 sm:$0xff]  }
  0x95   :  { %1853 = vmatprep.subr.bf16.mxu1 %v2566_v11  ;;  %v2645_v11 = vld [vmem:[#allocation5 + $0x5e4] ss:$8 sps:$4 sm:$0xff]  }
  0x97   :  { %1813 = vmatpush2.bf16.msra.mxu0 %v2561_v12  ;;  %v2640_v12 = vld [vmem:[#allocation5 + $0x4e0] ss:$8 sps:$4 sm:$0xff]  }
  0x98   :  { %1854 = vmatpush2.bf16.msra.mxu1 %v2564_v13  ;;  %1814 = vmatprep.subr.bf16.mxu0 %v2569_v14  ;;  %v2643_v13 = vld [vmem:[#allocation5 + $0x5e0] ss:$8 sps:$4 sm:$0xff]   ;;  %v2648_v14 = vld [vmem:[#allocation5 + $0x4d4] ss:$8 sps:$4 sm:$0xff]  }
  0x99   :  { %1855 = vmatprep.subr.bf16.mxu1 %v2572_v15  ;;  %v2651_v15 = vld [vmem:[#allocation5 + $0x5d4] ss:$8 sps:$4 sm:$0xff]  }
  0x9b   :  { %1815 = vmatpush2.bf16.msra.mxu0 %v2567_v16  ;;  %v2646_v16 = vld [vmem:[#allocation5 + $0x4d0] ss:$8 sps:$4 sm:$0xff]  }
  0x9c   :  { %1856 = vmatpush2.bf16.msra.mxu1 %v2570_v17  ;;  %1816 = vmatprep.subr.bf16.mxu0 %v2575_v18  ;;  %v2649_v17 = vld [vmem:[#allocation5 + $0x5d0] ss:$8 sps:$4 sm:$0xff]   ;;  %v2654_v18 = vld [vmem:[#allocation5 + $0x4c4] ss:$8 sps:$4 sm:$0xff]  }
  0x9d   :  { %1857 = vmatprep.subr.bf16.mxu1 %v2578_v19  ;;  %v2657_v19 = vld [vmem:[#allocation5 + $0x5c4] ss:$8 sps:$4 sm:$0xff]  }
  0x9f   :  { %1817 = vmatpush2.bf16.msra.mxu0 %v2573_v20  ;;  %v2652_v20 = vld [vmem:[#allocation5 + $0x4c0] ss:$8 sps:$4 sm:$0xff]  }
  0xa0   :  { %1858 = vmatpush2.bf16.msra.mxu1 %v2576_v21  ;;  %1818 = vmatprep.subr.bf16.mxu0 %v2581_v22  ;;  %v2655_v21 = vld [vmem:[#allocation5 + $0x5c0] ss:$8 sps:$4 sm:$0xff]   ;;  %v2660_v22 = vld [vmem:[#allocation5 + $0x4b4] ss:$8 sps:$4 sm:$0xff]  }
  0xa1   :  { %1859 = vmatprep.subr.bf16.mxu1 %v2584_v23  ;;  %v2663_v23 = vld [vmem:[#allocation5 + $0x5b4] ss:$8 sps:$4 sm:$0xff]  }
  0xa3   :  { %1819 = vmatpush2.bf16.msra.mxu0 %v2579_v24  ;;  %v2658_v24 = vld [vmem:[#allocation5 + $0x4b0] ss:$8 sps:$4 sm:$0xff]  }
  0xa4   :  { %1860 = vmatpush2.bf16.msra.mxu1 %v2582_v25  ;;  %1870 = vmatprep.subr.bf16.mxu0 %v2588_v26  ;;  %v2661_v25 = vld [vmem:[#allocation5 + $0x5b0] ss:$8 sps:$4 sm:$0xff]   ;;  %v2666_v26 = vld [vmem:[#allocation5 + $0x4a4] ss:$8 sps:$4 sm:$0xff]  }
  0xa5   :  { %1911 = vmatprep.subr.bf16.mxu1 %v2591_v27  ;;  %v2669_v27 = vld [vmem:[#allocation5 + $0x5a4] ss:$8 sps:$4 sm:$0xff]  }
  0xa6   :  { %1821 = vmatmul.mubr.bf16.vlgmr.msra.gmra.mxu0 %v148_v28  ;;  %v55_v28 = vld [vmem:[#allocation2 + $0x18] sm:$0xff] }
  0xa7   :  { %1862 = vmatmul.mubr.bf16.vlgmr.msra.gmra.mxu1 %v150_v29  ;;  %1871 = vmatpush1.bf16.msra.mxu0 %v2586_v30  ;;  %v2664_v29 = vld [vmem:[#allocation5 + $0x4a0] ss:$8 sps:$4 sm:$0xff]   ;;  %v111_v33 = vcombine.high %v55_v28, %v55_v28 }
  0xa8   :  { %1912 = vmatpush1.bf16.msra.mxu1 %v2589_v31  ;;  %1872 = vmatprep.subr.bf16.mxu0 %v2594_v32  ;;  %v2667_v30 = vld [vmem:[#allocation5 + $0x5a0] ss:$8 sps:$4 sm:$0xff]   ;;  %v2672_v31 = vld [vmem:[#allocation5 + $0x494] ss:$8 sps:$4 sm:$0xff]  }
  0xa9   :  { %1913 = vmatprep.subr.bf16.mxu1 %v2597_v34  ;;  %1902 = vmatprep.mubr.bf16.mxu0 %v153_v44  ;;  %v2675_v32 = vld [vmem:[#allocation5 + $0x594] ss:$8 sps:$4 sm:$0xff]   ;;  %v2670_v34 = vld [vmem:[#allocation5 + $0x490] ss:$8 sps:$4 sm:$0xff]   ;;  %v2679_v44 = vld [vmem:[#allocation5 + $0x580] ss:$8 sps:$4 sm:$0xff]  }
  0xaa   :  { %1943 = vmatprep.mubr.bf16.mxu1 %v155_v47 }
  0xab   :  { %1873 = vmatpush1.bf16.msra.mxu0 %v2592_v37  ;;  %v2678_v37 = vld [vmem:[#allocation5 + $0x484] ss:$8 sps:$4 sm:$0xff]  }
  0xac   :  { %1914 = vmatpush1.bf16.msra.mxu1 %v2595_v40  ;;  %1874 = vmatprep.subr.bf16.mxu0 %v2600_v41  ;;  %v2938_v40 = vrot.slane %v55_v28, %v2909_v49  ;;  %v2941_v41 = vrot.slane %v111_v33, %v2909_v49  ;;  %v154_v49 = vpack.c.bf16 %v2933_v39, %v2933_v39  ;;  %v2700_v39 = vld [vmem:[#allocation5 + $0x754] ss:$8 sps:$4 sm:$0xff]   ;;  %v2746_v28 = vld [vmem:[#allocation5 + $0x7d0] ss:$8 sps:$4 sm:$0xff]  }
  0xad   :  { %1915 = vmatprep.subr.bf16.mxu1 %v2603_v42  ;;  %v2676_v42 = vld [vmem:[#allocation5 + $0x480] ss:$8 sps:$4 sm:$0xff]   ;;  %v2757_v33 = vld [vmem:[#allocation5 + $0x6b4] ss:$8 sps:$4 sm:$0xff]  }
  0xae   :  { %v126_v47 = vcombine.high %v2938_v40, %v2938_v40 }
  0xaf   :  { %1875 = vmatpush1.bf16.msra.mxu0 %v2598_v46  ;;  %v2688_v46 = vld [vmem:[#allocation5 + $0x774] ss:$8 sps:$4 sm:$0xff]  }
  0xb0   :  { %1916 = vmatpush1.bf16.msra.mxu1 %v2601_v48  ;;  %1876 = vmatprep.subr.bf16.mxu0 %v2606_v50  ;;  %v127_v48 = vcombine.high %v2941_v41, %v2941_v41  ;;  %v152_v50 = vpack.c.bf16 %v2928_v35, %v2928_v35  ;;  %v2697_v35 = vld [vmem:[#allocation5 + $0x654] ss:$8 sps:$4 sm:$0xff]  }
  0xb1   :  { %1917 = vmatprep.subr.bf16.mxu1 %v2609_v51  ;;  %v2683_v51 = vld [vmem:[#allocation5 + $0x670] ss:$8 sps:$4 sm:$0xff]  }
  0xb3   :  { %1877 = vmatpush1.bf16.msra.mxu0 %v2604_v52  ;;  %v2686_v52 = vld [vmem:[#allocation5 + $0x770] ss:$8 sps:$4 sm:$0xff]  }
  0xb4   :  { %1918 = vmatpush1.bf16.msra.mxu1 %v2607_v53  ;;  %1878 = vmatprep.subr.bf16.mxu0 %v2612_v54  ;;  %v2691_v53 = vld [vmem:[#allocation5 + $0x664] ss:$8 sps:$4 sm:$0xff]  }
  0xb5   :  { %1919 = vmatprep.subr.bf16.mxu1 %v2615_v55  ;;  %v2694_v54 = vld [vmem:[#allocation5 + $0x764] ss:$8 sps:$4 sm:$0xff]   ;;  %v157_v55 = vpack.c.bf16 %v126_v47, %v126_v47  ;;  %v2772_v47 = vld [vmem:[#allocation5 + $0x794] ss:$8 sps:$4 sm:$0xff]  }
  0xb7   :  { %1879 = vmatpush1.bf16.msra.mxu0 %v2610_v56  ;;  %v159_v56 = vpack.c.bf16 %v127_v48, %v127_v48  ;;  %v2767_v48 = vld [vmem:[#allocation5 + $0x690] ss:$8 sps:$4 sm:$0xff]  }
  0xb8   :  { %1920 = vmatpush1.bf16.msra.mxu1 %v2613_v57  ;;  %1880 = vmatprep.subr.bf16.mxu0 %v2618_v58  ;;  %v2689_v57 = vld [vmem:[#allocation5 + $0x660] ss:$8 sps:$4 sm:$0xff]  }
  0xb9   :  { %1921 = vmatprep.subr.bf16.mxu1 %v2621_v59  ;;  %v2692_v58 = vld [vmem:[#allocation5 + $0x760] ss:$8 sps:$4 sm:$0xff]   ;;  %v2695_v59 = vld [vmem:[#allocation5 + $0x650] ss:$8 sps:$4 sm:$0xff]  }
  0xbb   :  { %1881 = vmatpush1.bf16.msra.mxu0 %v2616_v60  ;;  %v2698_v60 = vld [vmem:[#allocation5 + $0x750] ss:$8 sps:$4 sm:$0xff]  }
  0xbc   :  { %1922 = vmatpush1.bf16.msra.mxu1 %v2619_v61  ;;  %1882 = vmatprep.subr.bf16.mxu0 %v2624_v62  ;;  %v2703_v61 = vld [vmem:[#allocation5 + $0x644] ss:$8 sps:$4 sm:$0xff]  }
  0xbd   :  { %1923 = vmatprep.subr.bf16.mxu1 %v2627_v63  ;;  %v2706_v62 = vld [vmem:[#allocation5 + $0x744] ss:$8 sps:$4 sm:$0xff]   ;;  %v2701_v63 = vld [vmem:[#allocation5 + $0x640] ss:$8 sps:$4 sm:$0xff]  }
  0xbf   :  { %1883 = vmatpush1.bf16.msra.mxu0 %v2622_v0  ;;  %v2704_v0 = vld [vmem:[#allocation5 + $0x740] ss:$8 sps:$4 sm:$0xff]  }
  0xc0   :  { %1924 = vmatpush1.bf16.msra.mxu1 %v2625_v1  ;;  %1884 = vmatprep.subr.bf16.mxu0 %v2630_v2  ;;  %v2709_v1 = vld [vmem:[#allocation5 + $0x634] ss:$8 sps:$4 sm:$0xff]  }
  0xc1   :  { %1925 = vmatprep.subr.bf16.mxu1 %v2633_v3  ;;  %v2712_v2 = vld [vmem:[#allocation5 + $0x734] ss:$8 sps:$4 sm:$0xff]   ;;  %v2707_v3 = vld [vmem:[#allocation5 + $0x630] ss:$8 sps:$4 sm:$0xff]  }
  0xc3   :  { %1885 = vmatpush1.bf16.msra.mxu0 %v2628_v4  ;;  %v2710_v4 = vld [vmem:[#allocation5 + $0x730] ss:$8 sps:$4 sm:$0xff]  }
  0xc4   :  { %1926 = vmatpush1.bf16.msra.mxu1 %v2631_v5  ;;  %1886 = vmatprep.subr.bf16.mxu0 %v2636_v6  ;;  %v2715_v5 = vld [vmem:[#allocation5 + $0x624] ss:$8 sps:$4 sm:$0xff]  }
  0xc5   :  { %1927 = vmatprep.subr.bf16.mxu1 %v2639_v7  ;;  %v2718_v6 = vld [vmem:[#allocation5 + $0x724] ss:$8 sps:$4 sm:$0xff]   ;;  %v2713_v7 = vld [vmem:[#allocation5 + $0x620] ss:$8 sps:$4 sm:$0xff]  }
  0xc7   :  { %1887 = vmatpush2.bf16.msra.mxu0 %v2634_v8  ;;  %v2716_v8 = vld [vmem:[#allocation5 + $0x720] ss:$8 sps:$4 sm:$0xff]  }
  0xc8   :  { %1928 = vmatpush2.bf16.msra.mxu1 %v2637_v9  ;;  %1888 = vmatprep.subr.bf16.mxu0 %v2642_v10  ;;  %v2721_v9 = vld [vmem:[#allocation5 + $0x614] ss:$8 sps:$4 sm:$0xff]  }
  0xc9   :  { %1929 = vmatprep.subr.bf16.mxu1 %v2645_v11  ;;  %v2724_v10 = vld [vmem:[#allocation5 + $0x714] ss:$8 sps:$4 sm:$0xff]   ;;  %v2719_v11 = vld [vmem:[#allocation5 + $0x610] ss:$8 sps:$4 sm:$0xff]  }
  0xcb   :  { %1889 = vmatpush2.bf16.msra.mxu0 %v2640_v12  ;;  %v2722_v12 = vld [vmem:[#allocation5 + $0x710] ss:$8 sps:$4 sm:$0xff]  }
  0xcc   :  { %1930 = vmatpush2.bf16.msra.mxu1 %v2643_v13  ;;  %1890 = vmatprep.subr.bf16.mxu0 %v2648_v14  ;;  %v2727_v13 = vld [vmem:[#allocation5 + $0x604] ss:$8 sps:$4 sm:$0xff]  }
  0xcd   :  { %1931 = vmatprep.subr.bf16.mxu1 %v2651_v15  ;;  %v2730_v14 = vld [vmem:[#allocation5 + $0x704] ss:$8 sps:$4 sm:$0xff]   ;;  %v2725_v15 = vld [vmem:[#allocation5 + $0x600] ss:$8 sps:$4 sm:$0xff]  }
  0xcf   :  { %1891 = vmatpush2.bf16.msra.mxu0 %v2646_v16  ;;  %v2728_v16 = vld [vmem:[#allocation5 + $0x700] ss:$8 sps:$4 sm:$0xff]  }
  0xd0   :  { %1932 = vmatpush2.bf16.msra.mxu1 %v2649_v17  ;;  %1892 = vmatprep.subr.bf16.mxu0 %v2654_v18  ;;  %v2733_v17 = vld [vmem:[#allocation5 + $0x6f4] ss:$8 sps:$4 sm:$0xff]  }
  0xd1   :  { %1933 = vmatprep.subr.bf16.mxu1 %v2657_v19  ;;  %v2736_v18 = vld [vmem:[#allocation5 + $0x7f4] ss:$8 sps:$4 sm:$0xff]   ;;  %v2731_v19 = vld [vmem:[#allocation5 + $0x6f0] ss:$8 sps:$4 sm:$0xff]  }
  0xd3   :  { %1893 = vmatpush2.bf16.msra.mxu0 %v2652_v20  ;;  %v2734_v20 = vld [vmem:[#allocation5 + $0x7f0] ss:$8 sps:$4 sm:$0xff]  }
  0xd4   :  { %1934 = vmatpush2.bf16.msra.mxu1 %v2655_v21  ;;  %1894 = vmatprep.subr.bf16.mxu0 %v2660_v22  ;;  %v2739_v21 = vld [vmem:[#allocation5 + $0x6e4] ss:$8 sps:$4 sm:$0xff]  }
  0xd5   :  { %1935 = vmatprep.subr.bf16.mxu1 %v2663_v23  ;;  %v2742_v22 = vld [vmem:[#allocation5 + $0x7e4] ss:$8 sps:$4 sm:$0xff]   ;;  %v2737_v23 = vld [vmem:[#allocation5 + $0x6e0] ss:$8 sps:$4 sm:$0xff]  }
  0xd7   :  { %1895 = vmatpush2.bf16.msra.mxu0 %v2658_v24  ;;  %v2740_v24 = vld [vmem:[#allocation5 + $0x7e0] ss:$8 sps:$4 sm:$0xff]  }
  0xd8   :  { %1936 = vmatpush2.bf16.msra.mxu1 %v2661_v25  ;;  %1896 = vmatprep.subr.bf16.mxu0 %v2666_v26  ;;  %v2745_v25 = vld [vmem:[#allocation5 + $0x6d4] ss:$8 sps:$4 sm:$0xff]  }
  0xd9   :  { %1937 = vmatprep.subr.bf16.mxu1 %v2669_v27  ;;  %v2748_v26 = vld [vmem:[#allocation5 + $0x7d4] ss:$8 sps:$4 sm:$0xff]   ;;  %v2743_v27 = vld [vmem:[#allocation5 + $0x6d0] ss:$8 sps:$4 sm:$0xff]  }
  0xdb   :  { %1897 = vmatpush2.bf16.msra.mxu0 %v2664_v29  ;;  %v2751_v29 = vld [vmem:[#allocation5 + $0x6c4] ss:$8 sps:$4 sm:$0xff]  }
  0xdc   :  { %1938 = vmatpush2.bf16.msra.mxu1 %v2667_v30  ;;  %1898 = vmatprep.subr.bf16.mxu0 %v2672_v31  ;;  %v2754_v30 = vld [vmem:[#allocation5 + $0x7c4] ss:$8 sps:$4 sm:$0xff]   ;;  %v2749_v31 = vld [vmem:[#allocation5 + $0x6c0] ss:$8 sps:$4 sm:$0xff]  }
  0xdd   :  { %1939 = vmatprep.subr.bf16.mxu1 %v2675_v32  ;;  %v2752_v32 = vld [vmem:[#allocation5 + $0x7c0] ss:$8 sps:$4 sm:$0xff]  }
  0xdf   :  { %1899 = vmatpush2.bf16.msra.mxu0 %v2670_v34  ;;  %v2760_v34 = vld [vmem:[#allocation5 + $0x7b4] ss:$8 sps:$4 sm:$0xff]  }
  0xe0   :  { %1940 = vmatpush2.bf16.msra.mxu1 %v2673_v36  ;;  %1900 = vmatprep.subr.bf16.mxu0 %v2678_v37  ;;  %v2755_v36 = vld [vmem:[#allocation5 + $0x6b0] ss:$8 sps:$4 sm:$0xff]  }
  0xe1   :  { %1941 = vmatprep.subr.bf16.mxu1 %v2681_v38  ;;  %v2758_v37 = vld [vmem:[#allocation5 + $0x7b0] ss:$8 sps:$4 sm:$0xff]   ;;  %v2763_v38 = vld [vmem:[#allocation5 + $0x6a4] ss:$8 sps:$4 sm:$0xff]  }
  0xe3   :  { %1901 = vmatpush2.bf16.msra.mxu0 %v2676_v42  ;;  %v2766_v42 = vld [vmem:[#allocation5 + $0x7a4] ss:$8 sps:$4 sm:$0xff]  }
  0xe4   :  { %1942 = vmatpush2.bf16.msra.mxu1 %v2679_v44  ;;  %1952 = vmatprep.subr.bf16.mxu0 %v2685_v45  ;;  %v2761_v44 = vld [vmem:[#allocation5 + $0x6a0] ss:$8 sps:$4 sm:$0xff]  }
  0xe5   :  { %1993 = vmatprep.subr.bf16.mxu1 %v2688_v46  ;;  %v2764_v45 = vld [vmem:[#allocation5 + $0x7a0] ss:$8 sps:$4 sm:$0xff]   ;;  %v2769_v46 = vld [vmem:[#allocation5 + $0x694] ss:$8 sps:$4 sm:$0xff]  }
  0xe6   :  { %1903 = vmatmul.mubr.bf16.vlgmr.msra.gmra.mxu0 %v152_v50  ;;  %v2770_v50 = vld [vmem:[#allocation5 + $0x790] ss:$8 sps:$4 sm:$0xff]  }
  0xe7   :  { %1944 = vmatmul.mubr.bf16.vlgmr.msra.gmra.mxu1 %v154_v49  ;;  %1953 = vmatpush1.bf16.msra.mxu0 %v2683_v51  ;;  %v2775_v49 = vld [vmem:[#allocation5 + $0x684] ss:$8 sps:$4 sm:$0xff]  }
  0xe8   :  { %1994 = vmatpush1.bf16.msra.mxu1 %v2686_v52  ;;  %1954 = vmatprep.subr.bf16.mxu0 %v2691_v53  ;;  %v2778_v51 = vld [vmem:[#allocation5 + $0x784] ss:$8 sps:$4 sm:$0xff]   ;;  %v2773_v52 = vld [vmem:[#allocation5 + $0x680] ss:$8 sps:$4 sm:$0xff]  }
  0xe9   :  { %1995 = vmatprep.subr.bf16.mxu1 %v2694_v54  ;;  %1984 = vmatprep.mubr.bf16.mxu0 %v157_v55  ;;  %v2776_v53 = vld [vmem:[#allocation5 + $0x780] ss:$8 sps:$4 sm:$0xff]   ;;  %v420_v54 = vsub.s32 0, %v2906_v43 }
  0xea   :  { %2025 = vmatprep.mubr.bf16.mxu1 %v159_v56  ;;  %v2952_v55 = vld [vmem:[#allocation7] sm:$0xff]  ;;  %v156_v56 = vpack.c.bf16 %v2938_v40, %v2938_v40 }
  0xeb   :  { %1955 = vmatpush1.bf16.msra.mxu0 %v2689_v57  ;;  %v158_v57 = vpack.c.bf16 %v2941_v41, %v2941_v41 }
  0xec   :  { %1996 = vmatpush1.bf16.msra.mxu1 %v2692_v58  ;;  %1956 = vmatprep.subr.bf16.mxu0 %v2697_v35  ;;  %v2958_v58 = vld [vmem:[#allocation7 + $0x8] sm:$0xff]  ;;  %v421_v35 = vrot.slane %v2952_v55, %v420_v54 }
  0xed   :  { %1997 = vmatprep.subr.bf16.mxu1 %v2700_v39  ;;  %v425_v39 = vrot.slane %v2958_v58, %v420_v54 }
  0xef   :  { %1957 = vmatpush1.bf16.msra.mxu0 %v2695_v59 }
  0xf0   :  { %1998 = vmatpush1.bf16.msra.mxu1 %v2698_v60  ;;  %1958 = vmatprep.subr.bf16.mxu0 %v2703_v61 }
  0xf1   :  { %1999 = vmatprep.subr.bf16.mxu1 %v2706_v62 }
  0xf3   :  { %1959 = vmatpush1.bf16.msra.mxu0 %v2701_v63 }
  0xf4   :  { %2000 = vmatpush1.bf16.msra.mxu1 %v2704_v0  ;;  %1960 = vmatprep.subr.bf16.mxu0 %v2709_v1 }
  0xf5   :  { %2001 = vmatprep.subr.bf16.mxu1 %v2712_v2 }
  0xf7   :  { %1961 = vmatpush1.bf16.msra.mxu0 %v2707_v3 }
  0xf8   :  { %2002 = vmatpush1.bf16.msra.mxu1 %v2710_v4  ;;  %1962 = vmatprep.subr.bf16.mxu0 %v2715_v5 }
  0xf9   :  { %2003 = vmatprep.subr.bf16.mxu1 %v2718_v6 }
  0xfb   :  { %1963 = vmatpush1.bf16.msra.mxu0 %v2713_v7 }
  0xfc   :  { %2004 = vmatpush1.bf16.msra.mxu1 %v2716_v8  ;;  %1964 = vmatprep.subr.bf16.mxu0 %v2721_v9 }
  0xfd   :  { %2005 = vmatprep.subr.bf16.mxu1 %v2724_v10 }
  0xff   :  { %1965 = vmatpush1.bf16.msra.mxu0 %v2719_v11 }
 0x100   :  { %2006 = vmatpush1.bf16.msra.mxu1 %v2722_v12  ;;  %1966 = vmatprep.subr.bf16.mxu0 %v2727_v13 }
 0x101   :  { %2007 = vmatprep.subr.bf16.mxu1 %v2730_v14 }
 0x103   :  { %1967 = vmatpush1.bf16.msra.mxu0 %v2725_v15 }
 0x104   :  { %2008 = vmatpush1.bf16.msra.mxu1 %v2728_v16  ;;  %1968 = vmatprep.subr.bf16.mxu0 %v2733_v17 }
 0x105   :  { %2009 = vmatprep.subr.bf16.mxu1 %v2736_v18 }
 0x107   :  { %1969 = vmatpush2.bf16.msra.mxu0 %v2731_v19 }
 0x108   :  { %2010 = vmatpush2.bf16.msra.mxu1 %v2734_v20  ;;  %1970 = vmatprep.subr.bf16.mxu0 %v2739_v21 }
 0x109   :  { %2011 = vmatprep.subr.bf16.mxu1 %v2742_v22 }
 0x10b   :  { %1971 = vmatpush2.bf16.msra.mxu0 %v2737_v23 }
 0x10c   :  { %2012 = vmatpush2.bf16.msra.mxu1 %v2740_v24  ;;  %1972 = vmatprep.subr.bf16.mxu0 %v2745_v25 }
 0x10d   :  { %2013 = vmatprep.subr.bf16.mxu1 %v2748_v26 }
 0x10f   :  { %1973 = vmatpush2.bf16.msra.mxu0 %v2743_v27 }
 0x110   :  { %2014 = vmatpush2.bf16.msra.mxu1 %v2746_v28  ;;  %1974 = vmatprep.subr.bf16.mxu0 %v2751_v29 }
 0x111   :  { %2015 = vmatprep.subr.bf16.mxu1 %v2754_v30 }
 0x113   :  { %1975 = vmatpush2.bf16.msra.mxu0 %v2749_v31 }
 0x114   :  { %2016 = vmatpush2.bf16.msra.mxu1 %v2752_v32  ;;  %1976 = vmatprep.subr.bf16.mxu0 %v2757_v33 }
 0x115   :  { %2017 = vmatprep.subr.bf16.mxu1 %v2760_v34 }
 0x117   :  { %1977 = vmatpush2.bf16.msra.mxu0 %v2755_v36 }
 0x118   :  { %2018 = vmatpush2.bf16.msra.mxu1 %v2758_v37  ;;  %1978 = vmatprep.subr.bf16.mxu0 %v2763_v38 }
 0x119   :  { %2019 = vmatprep.subr.bf16.mxu1 %v2766_v42 }
 0x11b   :  { %1979 = vmatpush2.bf16.msra.mxu0 %v2761_v44 }
 0x11c   :  { %2020 = vmatpush2.bf16.msra.mxu1 %v2764_v45  ;;  %1980 = vmatprep.subr.bf16.mxu0 %v2769_v46 }
 0x11d   :  { %2021 = vmatprep.subr.bf16.mxu1 %v2772_v47 }
 0x11f   :  { %1981 = vmatpush2.bf16.msra.mxu0 %v2767_v48 }
 0x120   :  { %2022 = vmatpush2.bf16.msra.mxu1 %v2770_v50  ;;  %1982 = vmatprep.subr.bf16.mxu0 %v2775_v49 }
 0x121   :  { %2023 = vmatprep.subr.bf16.mxu1 %v2778_v51 }
 0x123   :  { %1983 = vmatpush2.bf16.msra.mxu0 %v2773_v52 }
 0x124   :  { %2024 = vmatpush2.bf16.msra.mxu1 %v2776_v53 }
 0x126   :  { %v1740_v59 = vpop.f32.mrf.mxu0  ;;  %1985 = vmatmul.mubr.bf16.vlgmr.msra.gmra.mxu0 %v156_v56 }
 0x127   :  { %v1781_v60 = vpop.f32.mrf.mxu1  ;;  %2026 = vmatmul.mubr.bf16.vlgmr.msra.gmra.mxu1 %v158_v57  ;;  %v1741_v61 = vadd.f32 %v1740_v59, %v421_v35 }
 0x128   :  { %v1742_v62 = vpop.f32.mrf.mxu0 }
 0x129   :  { %v1783_v63 = vpop.f32.mrf.mxu1  ;;  %v1782_v0 = vadd.f32 %v1781_v60, %v1741_v61  ;;  %v1743_v40 = vadd.f32 %v1742_v62, %v425_v39 }
 0x12a   :  { %v1744_v1 = vpop.f32.mrf.mxu0 }
 0x12b   :  { %v1785_v2 = vpop.f32.mrf.mxu1  ;;  %v1784_v41 = vadd.f32 %v1783_v63, %v1743_v40 }
 0x12c   :  { %v1745_v3 = vpop.f32.mrf.mxu0 }
 0x12d   :  { %v1786_v4 = vpop.f32.mrf.mxu1 }
 0x166   :  { %v1822_v5 = vpop.f32.mrf.mxu0 }
 0x167   :  { %v1863_v6 = vpop.f32.mrf.mxu1  ;;  %v1823_v7 = vadd.f32 %v1822_v5, %v1782_v0 }
 0x168   :  { %v1824_v8 = vpop.f32.mrf.mxu0 }
 0x169   :  { %v1865_v9 = vpop.f32.mrf.mxu1  ;;  %v1864_v10 = vadd.f32 %v1863_v6, %v1823_v7  ;;  %v1825_v11 = vadd.f32 %v1824_v8, %v1784_v41 }
 0x16a   :  { %v1826_v12 = vpop.f32.mrf.mxu0 }
 0x16b   :  { %v1867_v13 = vpop.f32.mrf.mxu1  ;;  %v1866_v14 = vadd.f32 %v1865_v9, %v1825_v11 }
 0x16c   :  { %v1827_v15 = vpop.f32.mrf.mxu0 }
 0x16d   :  { %v1868_v16 = vpop.f32.mrf.mxu1 }
 0x1a6   :  { %v1904_v17 = vpop.f32.mrf.mxu0 }
 0x1a7   :  { %v1945_v18 = vpop.f32.mrf.mxu1  ;;  %v1905_v19 = vadd.f32 %v1904_v17, %v1864_v10 }
 0x1a8   :  { %v1906_v20 = vpop.f32.mrf.mxu0 }
 0x1a9   :  { %v1947_v21 = vpop.f32.mrf.mxu1  ;;  %v1946_v22 = vadd.f32 %v1945_v18, %v1905_v19  ;;  %v1907_v27 = vadd.f32 %v1906_v20, %v1866_v14  ;;  %v2082_v20 = vsub.s32 1, %v2906_v43 }
 0x1aa   :  { %v1908_v23 = vpop.f32.mrf.mxu0 }
 0x1ab   :  { %v1949_v24 = vpop.f32.mrf.mxu1  ;;  %v1948_v30 = vadd.f32 %v1947_v21, %v1907_v27  ;;  %v2092_v21 = vsub.s32 2, %v2906_v43 }
 0x1ac   :  { %v1909_v25 = vpop.f32.mrf.mxu0 }
 0x1ad   :  { %v1950_v26 = vpop.f32.mrf.mxu1  ;;  %v2093_v24 = vrot.slane %v2952_v55, %v2092_v21  ;;  %v2087_v25 = vrot.slane %v2958_v58, %v2082_v20 }
 0x1e6   :  { %v1986_v28 = vpop.f32.mrf.mxu0 }
 0x1e7   :  { %v2027_v29 = vpop.f32.mrf.mxu1  ;;  %v1987_v31 = vadd.f32 %v1986_v28, %v1946_v22  ;;  %v2083_v22 = vrot.slane %v2952_v55, %v2082_v20  ;;  %v2097_v28 = vrot.slane %v2958_v58, %v2092_v21 }
 0x1e8   :  { %v1988_v32 = vpop.f32.mrf.mxu0 }
 0x1e9   :  { %v2029_v33 = vpop.f32.mrf.mxu1  ;;  %v2028_v34 = vadd.f32 %v2027_v29, %v1987_v31  ;;  %v1989_v36 = vadd.f32 %v1988_v32, %v1948_v30 }
 0x1ea   :  { %v1990_v37 = vpop.f32.mrf.mxu0 }
 0x1eb   :  { %v2031_v38 = vpop.f32.mrf.mxu1  ;;  %v2034_v42 = vmax.f32 %v2028_v34, 0.0  ;;  %v2030_v44 = vadd.f32 %v2029_v33, %v1989_v36 }
 0x1ec   :  { %v1991_v45 = vpop.f32.mrf.mxu0 }
 0x1ed   :  { %v2032_v46 = vpop.f32.mrf.mxu1  ;;  %v2037_v47 = vsel %vm2036_vm0, %v2034_v42, 0.0  ;;  %v2035_v48 = vmax.f32 %v2030_v44, 0.0 }
 0x1ee   :  { %v2038_v50 = vrot.slane %v2037_v47, 4 }
 0x1ef   :  { %v2044_v49 = vsel %vm2036_vm0, %v2035_v48, 0.0 }
 0x1f0   :  { %v2039_v51 = vadd.f32 %v2038_v50, %v2037_v47  ;;  %v2045_v52 = vrot.slane %v2044_v49, 4 }
 0x1f2   :  { %v2040_v53 = vrot.slane %v2039_v51, 2  ;;  %v2046_v54 = vadd.f32 %v2045_v52, %v2044_v49 }
 0x1f4   :  { %v2041_v56 = vadd.f32 %v2040_v53, %v2039_v51  ;;  %v2047_v57 = vrot.slane %v2046_v54, 2 }
 0x1f6   :  { %v2042_v35 = vrot.slane %v2041_v56, 1  ;;  %v2048_v39 = vadd.f32 %v2047_v57, %v2046_v54 }
 0x1f8   :  { %v2043_v59 = vadd.f32 %v2042_v35, %v2041_v56  ;;  %v2049_v60 = vrot.slane %v2048_v39, 1 }
 0x1fa   :  { %v2052_v61 = vmul.f32 0.5, %v2043_v59  ;;  %v2050_v62 = vadd.f32 %v2049_v60, %v2048_v39 }
 0x1fc   :  { %v2054_v63 = vsub.f32 %v2034_v42, %v2052_v61  ;;  %v2053_v0 = vmul.f32 0.5, %v2050_v62 }
 0x1fe   :  { %v2056_v40 = vmul.f32 %v2054_v63, %v2054_v63  ;;  %v2055_v1 = vsub.f32 %v2035_v48, %v2053_v0 }
 0x200   :  { %v2058_v2 = vsel %vm2036_vm0, %v2056_v40, 0.0  ;;  %v2057_v41 = vmul.f32 %v2055_v1, %v2055_v1 }
 0x201   :  { %v2059_v3 = vrot.slane %v2058_v2, 4 }
 0x202   :  { %v2065_v4 = vsel %vm2036_vm0, %v2057_v41, 0.0 }
 0x203   :  { %v2060_v5 = vadd.f32 %v2059_v3, %v2058_v2  ;;  %v2066_v6 = vrot.slane %v2065_v4, 4 }
 0x205   :  { %v2061_v7 = vrot.slane %v2060_v5, 2  ;;  %v2067_v8 = vadd.f32 %v2066_v6, %v2065_v4 }
 0x207   :  { %v2062_v9 = vadd.f32 %v2061_v7, %v2060_v5  ;;  %v2068_v10 = vrot.slane %v2067_v8, 2 }
 0x209   :  { %v2063_v11 = vrot.slane %v2062_v9, 1  ;;  %v2069_v12 = vadd.f32 %v2068_v10, %v2067_v8 }
 0x20b   :  { %v2064_v13 = vadd.f32 %v2063_v11, %v2062_v9  ;;  %v2070_v14 = vrot.slane %v2069_v12, 1 }
 0x20d   :  { %v2072_v15 = vmul.f32 0.5, %v2064_v13  ;;  %v2071_v16 = vadd.f32 %v2070_v14, %v2069_v12 }
 0x20f   :  { %v2074_v17 = vadd.f32 1e-05, %v2072_v15  ;;  %v2073_v18 = vmul.f32 0.5, %v2071_v16 }
 0x211   :  { %2780 = vrsqrt.f32 %v2074_v17  ;;  %v2075_v19 = vadd.f32 1e-05, %v2073_v18 }
 0x213   :  { %2782 = vrsqrt.f32 %v2075_v19 }
 0x21e   :  { %v2781_v23 = vpop.eup %2780 }
 0x21f   :  { %v2078_v26 = vmul.f32 %v2781_v23, %v2054_v63 }
 0x220   :  { %v2783_v27 = vpop.eup %2782 }
 0x221   :  { %v2088_v29 = vmul.f32 %v2083_v22, %v2078_v26  ;;  %v2079_v30 = vmul.f32 %v2783_v27, %v2055_v1 }
 0x223   :  { %v2089_v31 = vmul.f32 %v2087_v25, %v2079_v30  ;;  %v2098_v32 = vadd.f32 %v2093_v24, %v2088_v29 }
 0x225   :  { %v2099_v33 = vadd.f32 %v2097_v28, %v2089_v31 }
 0x227   :  { %v2102_v34 = vcombine.low %v2098_v32, %v2099_v33 }
 0x229   :  { %2384 = vst.sshfl [vmem:[#allocation8] sm:$0x33 pattern:$0x76325410] %v2102_v34 }
 0x22a   :  { %2855 = shalt.err (!%p2852_p5)
}
 0x22b   :  { %2121 = dma.vmem_to_hbm [thread:$0]  %s2119_s2, 64, %s2978_s3, [#allocation4]  }
 0x22c   :  { %2868 = dma.done.wait [#allocation4], 64  }
 0x22d   :  { %2869 = vsyncadd [#allocation4], 4294967232 }
 0x22e   :  { %2125 = vsyncpa [#allocation3], 1 }
 0x22f   :  { %2126 = vsyncpa [#allocation6], 1 }
 0x230   :  { %2127 = vsyncpa [#allocation4], 1 }

</bundles_post_ra>
